<compile_context>
chip_gen: v7x
topology: tpu7x:2x2x1
jax: 0.10.0
libtpu: 0.0.40
codegen_flags: <defaults>
</compile_context>

<pallas_src>
import functools

import jax
import jax.numpy as jnp
from jax.experimental import pallas as pl
from jax.experimental.pallas import tpu as pltpu


def _round_up(x, m):
    return (x + m - 1) // m * m


def _ordinal_loss_kernel(*refs, batch, block_b, has_weight):
    """One grid step: unnormalized partial loss sum over one lane-tile of the batch."""
    if has_weight:
        logits_ref, targets_ref, weight_ref, out_ref = refs
    else:
        logits_ref, targets_ref, out_ref = refs
        weight_ref = None

    x = logits_ref[...].astype(jnp.float32)              # [T, TB] upcast in-register
    t = targets_ref[...]                                  # [1, TB] int32
    T, TB = x.shape

    # thresholds 1..T, one per sublane row (computed once per grid step)
    thr = jax.lax.broadcasted_iota(jnp.int32, (T, TB), 0) + 1
    # BCE-with-logits == softplus(x * sign):  sign = +1 if target < thr else -1
    sign = jnp.where(t >= thr, -1.0, 1.0)                 # [T, TB] f32
    per = jnp.maximum(x * sign, 0.0) + jnp.log1p(jnp.exp(-jnp.abs(x)))
    if has_weight:
        per = per * weight_ref[...]                        # [T,1] broadcast over lanes

    # sum over thresholds (sublane axis), then mask padded batch lanes
    col = jnp.sum(per, axis=0, keepdims=True)              # [1, TB]
    lane = jax.lax.broadcasted_iota(jnp.int32, (1, TB), 1) + pl.program_id(0) * block_b
    col = jnp.where(lane < batch, col, 0.0)

    partial = jnp.sum(col, axis=1, keepdims=True)           # [1, 1]
    # lane-dense, unmasked store of this block's partial sum
    out_ref[...] = jnp.broadcast_to(partial, (8, 128))


def ordinal_regression_loss(logits, targets, num_classes, weight=None, *, block_b=4096):
    """Pallas TPU implementation of OrdinalRegressionLoss(num_classes, weight, 'mean')."""
    B, T = logits.shape
    assert T == num_classes - 1

    # Lane-dense layout: thresholds -> sublanes, batch -> lanes. Keep input dtype (no host upcast).
    logits_t = logits.T                                      # [T, B]
    targets2d = targets.reshape(1, B).astype(jnp.int32)      # [1, B]

    tb = min(_round_up(B, 128), _round_up(block_b, 128))
    b_pad = _round_up(B, tb)
    if b_pad != B:
        logits_t = jnp.pad(logits_t, ((0, 0), (0, b_pad - B)))
        targets2d = jnp.pad(targets2d, ((0, 0), (0, b_pad - B)))
    num_blocks = b_pad // tb

    has_weight = weight is not None
    in_specs = [
        pl.BlockSpec((T, tb), lambda i: (0, i)),
        pl.BlockSpec((1, tb), lambda i: (0, i)),
    ]
    args = [logits_t, targets2d]
    if has_weight:
        w = jnp.asarray(weight, dtype=jnp.float32).reshape(T, 1)
        in_specs.append(pl.BlockSpec((T, 1), lambda i: (0, 0)))
        args.append(w)

    kernel = functools.partial(
        _ordinal_loss_kernel, batch=B, block_b=tb, has_weight=has_weight
    )

    partial_tiles = pl.pallas_call(
        kernel,
        out_shape=jax.ShapeDtypeStruct((num_blocks * 8, 128), jnp.float32),
        grid=(num_blocks,),
        in_specs=in_specs,
        out_specs=pl.BlockSpec((8, 128), lambda i: (i, 0)),
        compiler_params=pltpu.CompilerParams(
            dimension_semantics=("parallel",),      # each block writes its own output tile
            vmem_limit_bytes=32 * 1024 * 1024,      # explicit: safe on v7x's 64 MiB VMEM
        ),
    )(*args)

    # tiny XLA reduce over per-block partials; single scale 1/(B*T) instead of two means
    partials = partial_tiles[0::8, 0]
    return jnp.sum(partials) * (1.0 / (B * T))
    # TODO(synk): only reduction='mean' is implemented (matches the module's default path).


def _reference(logits, targets, num_classes, weight=None):
    """Pure-JAX reference mirroring the PyTorch module (reduction='mean')."""
    T = num_classes - 1
    thr = jnp.arange(1, num_classes, dtype=jnp.float32)
    z = (targets.reshape(-1, 1).astype(jnp.float32) >= thr).astype(jnp.float32)
    x = logits.astype(jnp.float32)
    per = jnp.maximum(x, 0.0) - x * z + jnp.log1p(jnp.exp(-jnp.abs(x)))
    if weight is not None:
        per = per * jnp.asarray(weight, jnp.float32).reshape(1, T)
    return jnp.mean(jnp.mean(per, axis=1))


if __name__ == "__main__":
    num_classes = 5              # -> 4 thresholds
    batch = 8

    key = jax.random.PRNGKey(0)
    k_logits, k_targets, k_weight, k_logits2, k_targets2 = jax.random.split(key, 5)

    logits = jax.random.normal(k_logits, (batch, num_classes - 1), dtype=jnp.float32)
    targets = jax.random.randint(k_targets, (batch,), 0, num_classes, dtype=jnp.int32)
    weight = jax.random.uniform(k_weight, (num_classes - 1,), dtype=jnp.float32) + 0.5

    # weighted path
    loss_w = jax.block_until_ready(ordinal_regression_loss(logits, targets, num_classes, weight))
    ref_w = _reference(logits, targets, num_classes, weight)
    assert jnp.allclose(loss_w, ref_w, rtol=1e-5, atol=1e-5), (loss_w, ref_w)

    # unweighted path (weight input / multiply elided inside the kernel)
    loss_u = jax.block_until_ready(ordinal_regression_loss(logits, targets, num_classes, None))
    ref_u = _reference(logits, targets, num_classes, None)
    assert jnp.allclose(loss_u, ref_u, rtol=1e-5, atol=1e-5), (loss_u, ref_u)

    # multi-block grid + lane-mask path (still small): 3 blocks of 128 lanes, 300 valid
    batch2 = 300
    logits2 = jax.random.normal(k_logits2, (batch2, num_classes - 1), dtype=jnp.float32)
    targets2 = jax.random.randint(k_targets2, (batch2,), 0, num_classes, dtype=jnp.int32)
    loss2 = jax.block_until_ready(
        ordinal_regression_loss(logits2, targets2, num_classes, weight, block_b=128))
    ref2 = _reference(logits2, targets2, num_classes, weight)
    assert jnp.allclose(loss2, ref2, rtol=1e-5, atol=1e-5), (loss2, ref2)

    print("KERNEL_OK")
</pallas_src>

<mosaic_0001>
module attributes {stable_mosaic.version = 11 : i64} {
  func.func @_ordinal_loss_kernel(%arg0: i32, %arg1: memref<4x128xf32, #tpu.memory_space<vmem>>, %arg2: memref<1x128xi32, #tpu.memory_space<vmem>>, %arg3: memref<4x1xf32, #tpu.memory_space<vmem>>, %arg4: memref<8x128xf32, #tpu.memory_space<vmem>>) attributes {dimension_semantics = [#tpu.dimension_semantics<parallel>], iteration_bounds = array<i64: 1>, scalar_prefetch = 0 : i64, scratch_operands = 0 : i64, tpu.core_type = #tpu.core_type<tc>, window_params = [{transform_indices = @transform_0, window_bounds = array<i64: 4, 128>}, {transform_indices = @transform_1, window_bounds = array<i64: 1, 128>}, {pipeline_mode = #tpu.pipeline_mode<synchronous>, transform_indices = @transform_2, window_bounds = array<i64: 4, 1>}, {transform_indices = @transform_3, window_bounds = array<i64: 8, 128>}]} {
    %c0 = arith.constant 0 : index
    %c0_0 = arith.constant 0 : index
    %0 = vector.load %arg1[%c0, %c0_0] : memref<4x128xf32, #tpu.memory_space<vmem>>, vector<4x128xf32>
    %c0_1 = arith.constant 0 : index
    %c0_2 = arith.constant 0 : index
    %1 = vector.load %arg2[%c0_1, %c0_2] : memref<1x128xi32, #tpu.memory_space<vmem>>, vector<1x128xi32>
    %2 = tpu.iota {dimensions = array<i32: 0>} : vector<4x128xi32>
    %c1_i32 = arith.constant 1 : i32
    %3 = vector.broadcast %c1_i32 : i32 to vector<4x128xi32>
    %4 = arith.addi %2, %3 : vector<4x128xi32>
    %5 = vector.broadcast %1 : vector<1x128xi32> to vector<4x128xi32>
    %6 = arith.cmpi sge, %5, %4 : vector<4x128xi32>
    %cst = arith.constant -1.000000e+00 : f32
    %cst_3 = arith.constant 1.000000e+00 : f32
    %7 = vector.broadcast %cst : f32 to vector<4x128xf32>
    %8 = vector.broadcast %cst_3 : f32 to vector<4x128xf32>
    %9 = arith.select %6, %7, %8 : vector<4x128xi1>, vector<4x128xf32>
    %10 = arith.mulf %0, %9 : vector<4x128xf32>
    %cst_4 = arith.constant 0.000000e+00 : f32
    %11 = vector.broadcast %cst_4 : f32 to vector<4x128xf32>
    %12 = arith.maximumf %10, %11 : vector<4x128xf32>
    %13 = math.absf %0 : vector<4x128xf32>
    %cst_5 = arith.constant 0.000000e+00 : f32
    %14 = vector.broadcast %cst_5 : f32 to vector<4x128xf32>
    %15 = arith.subf %14, %13 : vector<4x128xf32>
    %16 = math.exp %15 : vector<4x128xf32>
    %17 = math.log1p %16 : vector<4x128xf32>
    %18 = arith.addf %12, %17 : vector<4x128xf32>
    %c0_6 = arith.constant 0 : index
    %c0_7 = arith.constant 0 : index
    %19 = vector.load %arg3[%c0_6, %c0_7] : memref<4x1xf32, #tpu.memory_space<vmem>>, vector<4x1xf32>
    %20 = vector.broadcast %19 : vector<4x1xf32> to vector<4x128xf32>
    %21 = arith.mulf %18, %20 : vector<4x128xf32>
    %cst_8 = arith.constant dense<0.000000e+00> : vector<128xf32>
    %22 = vector.multi_reduction <add>, %21, %cst_8 [0] : vector<4x128xf32> to vector<128xf32>
    %23 = vector.shape_cast %22 : vector<128xf32> to vector<1x128xf32>
    %24 = tpu.iota {dimensions = array<i32: 1>} : vector<1x128xi32>
    %c128_i32 = arith.constant 128 : i32
    %25 = arith.muli %arg0, %c128_i32 : i32
    %26 = vector.broadcast %25 : i32 to vector<1x128xi32>
    %27 = arith.addi %24, %26 : vector<1x128xi32>
    %c8_i32 = arith.constant 8 : i32
    %28 = vector.broadcast %c8_i32 : i32 to vector<1x128xi32>
    %29 = arith.cmpi slt, %27, %28 : vector<1x128xi32>
    %cst_9 = arith.constant 0.000000e+00 : f32
    %30 = vector.broadcast %cst_9 : f32 to vector<1x128xf32>
    %31 = arith.select %29, %23, %30 : vector<1x128xi1>, vector<1x128xf32>
    %cst_10 = arith.constant dense<0.000000e+00> : vector<1xf32>
    %32 = vector.multi_reduction <add>, %31, %cst_10 [1] : vector<1x128xf32> to vector<1xf32>
    %33 = vector.shape_cast %32 : vector<1xf32> to vector<1x1xf32>
    %34 = vector.shape_cast %33 : vector<1x1xf32> to vector<1x1xf32>
    %35 = vector.broadcast %34 : vector<1x1xf32> to vector<8x128xf32>
    %c0_11 = arith.constant 0 : index
    %c0_12 = arith.constant 0 : index
    %36 = vector.load %arg4[%c0_11, %c0_12] : memref<8x128xf32, #tpu.memory_space<vmem>>, vector<8x128xf32>
    tpu.vector_store %arg4[%c0_11, %c0_12], %35 {strides = array<i32>} : memref<8x128xf32, #tpu.memory_space<vmem>>, vector<8x128xf32>,
    return
  }
  func.func @transform_0(%arg0: i32) -> (i32, i32) {
    %c0_i32 = arith.constant 0 : i32
    %c0_i32_0 = arith.constant 0 : i32
    return %c0_i32, %arg0 : i32, i32
  }
  func.func @transform_1(%arg0: i32) -> (i32, i32) {
    %c0_i32 = arith.constant 0 : i32
    %c0_i32_0 = arith.constant 0 : i32
    return %c0_i32, %arg0 : i32, i32
  }
  func.func @transform_2(%arg0: i32) -> (i32, i32) {
    %c0_i32 = arith.constant 0 : i32
    %c0_i32_0 = arith.constant 0 : i32
    %c0_i32_1 = arith.constant 0 : i32
    return %c0_i32, %c0_i32_0 : i32, i32
  }
  func.func @transform_3(%arg0: i32) -> (i32, i32) {
    %c0_i32 = arith.constant 0 : i32
    %c0_i32_0 = arith.constant 0 : i32
    return %arg0, %c0_i32 : i32, i32
  }
}

</mosaic_0001>

<bundles_post_ra>
// kernel: tpu_custom_call.1
= control target key start
LH: loop header
LB: loop body
LE: loop exit
PB: predicated region body
PF: predicated region fallthrough
CT: control target
= control target key end

     0   :  { %v114_v1 = vmov 0   ;;  %s158_s0 = inlined_call_operand.vmem [shape: f32[4,128], index: 0, kind: input, shape index: {}]   ;;  %s159_s1 = inlined_call_operand.vmem [shape: s32[1,128], index: 1, kind: input, shape index: {}]   ;;  %s160_s2 = inlined_call_operand.vmem [shape: f32[4,1], index: 2, kind: input, shape index: {}]   ;;  %s161_s3 = inlined_call_operand.hbm [shape: f32[8,128], index: 3, kind: output, shape index: {}]  }
   0x1   :  { %v42_v0 = vld [vmem:[%s160_s2] sm:$0xf]  ;;  %85 = vset.pattern.permute.xlu0 %v114_v1 }
   0x2   :  { %45 = vperm.xlu0 %85, %v42_v0  }
   0x3   :  { %8 = vsyncpa [#allocation3], 0  ;;  %v15_v2 = vld [vmem:[%s158_s0] sm:$0xf]  ;;  %v17_v7 = vlaneseq  ;;  %v115_v13 = vmov 1.0   ;;  %vm49_vm2 = vcmask 1043456  }
   0x4   :  { %v28_v3 = vand.u32 2147483647, %v15_v2  ;;  %v81_v11 = vld [vmem:[%s159_s1] ss:$0 sm:$0xff]  ;;  %s116_s0 = smov [#allocation2]  }
   0x5   :  { %v18_v9 = vshrl.u32 %v17_v7, 7  ;;  %v58_v30 = vand.u32 127, %v17_v7  ;;  %s73_s1 = sshll.u32 %s116_s0, 4  ;;  %s74_s1 = int_to_ptr.vmem [resolvable:$true] %s73_s1 }
   0x6   :  { %v29_v4 = vsub.f32 0.0, %v28_v3  ;;  %s90_s17 = scalar_lea.vmem %s74_s1, 128  ;;  %p95_p1 = scmp.lt.s32.totalorder %s74_s1, %s74_s1 }
   0x7   :  { %v19_v10 = vadd.s32 1, %v18_v9  ;;  %vm62_vm3 = vcmp.lt.s32.totalorder %v58_v30, 8  ;;  %p91_p0 = scmp.ne.s32.totalorder %s74_s1, %s90_s17  ;;  %p96_p2 = scmp.lt.s32.totalorder %s90_s17, %s90_s17 }
   0x8   :  { %v30_v5 = vmul.f32 1.442695, %v29_v4 }
   0x9   :  { %vm24_vm0 = vcmp.ge.s32.totalorder %v81_v11, %v19_v10  ;;  %p97_p3 = por %p96_p2, %p95_p1 }
   0xa   :  { %86 = vpow2.f32 %v30_v5  ;;  %v25_v14 = vsel %vm24_vm0, -1.0, %v115_v13 }
   0xb   :  { %v26_v18 = vmul.f32 %v25_v14, %v15_v2  ;;  %p98_p4 = pnand %p97_p3, %p91_p0 }
   0xd   :  { %v27_v21 = vmax.f32 %v26_v18, 0.0 }
  0x14   :  { %v87_v6 = vpop.eup %86 }
  0x15   :  { %v32_v8 = vadd.f32 1.0, %v87_v6  ;;  %v35_v12 = vmul.f32 -0.5, %v87_v6  ;;  %v38_v17 = vand.u32 2147483647, %v87_v6 }
  0x17   :  { %88 = vlog2.f32 %v32_v8  ;;  %v36_v15 = vadd.f32 1.0, %v35_v12  ;;  %vm39_vm1 = vcmp.lt.f32.partialorder %v38_v17, 0.0004427343 }
  0x19   :  { %v37_v20 = vmul.f32 %v87_v6, %v36_v15 }
  0x21   :  { %v89_v16 = vpop.eup %88 }
  0x22   :  { %v34_v19 = vmul.f32 0.6931472, %v89_v16 }
  0x24   :  { %v40_v22 = vsel %vm39_vm1, %v37_v20, %v34_v19 }
  0x25   :  { %v41_v23 = vadd.f32 %v40_v22, %v27_v21 }
  0x81   :  { %v46_v24 = vpop.permute.xlu0 %45 }
  0x82   :  { %v48_v25 = vmul.f32 %v46_v24, %v41_v23 }
  0x84   :  { %v50_v26 = vsel %vm49_vm2, %v48_v25, 0.0 }
  0x85   :  { %v51_v27 = vrot.slane %v50_v26, 4 }
  0x87   :  { %v52_v28 = vadd.f32 %v51_v27, %v50_v26 }
  0x89   :  { %v53_v29 = vrot.slane %v52_v28, 2 }
  0x8b   :  { %v54_v31 = vadd.f32 %v53_v29, %v52_v28 }
  0x8d   :  { %v55_v32 = vrot.slane %v54_v31, 1 }
  0x8f   :  { %v56_v33 = vadd.f32 %v55_v32, %v54_v31 }
  0x91   :  { %v63_v34 = vsel %vm62_vm3, %v56_v33, 0.0 }
  0x92   :  { %64 = vadd.xlane.f32.xlu0 %v63_v34 }
 0x11f   :  { %v65_v35 = vpop.xlane.xlu0 %64 }
 0x120   :  { %66 = vst [vmem:[#allocation2] sm:$0xff] %v65_v35 }
 0x121   :  { %101 = shalt.err (!%p98_p4)
}
 0x122   :  { %s102_s20 = scalar_lea.hbm %s161_s3, 128 }
 0x123   :  { %p103_p5 = scmp.ne.s32.totalorder %s161_s3, %s102_s20  ;;  %p106_p6 = scmp.lt.u32.totalorder %s102_s20, %s161_s3 }
 0x125   :  { %p108_p7 = pnand %p106_p6, %p103_p5 }
 0x127   :  { %111 = shalt.err (!%p108_p7)
}
 0x128   :  { %76 = dma.vmem_to_hbm [thread:$0]  %s74_s1, 128, %s161_s3, [#allocation3]  }
 0x129   :  { %112 = dma.done.wait [#allocation3], 128  }
 0x12a   :  { %113 = vsyncadd [#allocation3], 4294967168 }
 0x12b   :  { %80 = vsyncpa [#allocation3], 1 }

</bundles_post_ra>
